<compile_context>
chip_gen: v6e
topology: v6e:2x2x1
jax: 0.10.0
libtpu: 0.0.40
codegen_flags: <defaults>
</compile_context>

<pallas_src>
import math
import functools

import jax
import jax.numpy as jnp
import numpy as np
from jax.experimental import pallas as pl
from jax.experimental.pallas import tpu as pltpu


# Contract the last dim of lhs with the last dim of rhs (A @ B^T).
_TRANS_B = (((1,), (1,)), ((), ()))


# ---------------------------------------------------------------------------
# Pallas kernels
# ---------------------------------------------------------------------------
def _qkv_kernel(x_ref, s_ref, wq_ref, bq_ref, wk_ref, bk_ref, wv_ref, bv_ref,
                q_ref, k_ref, v_ref, *, scale):
    """Fused Q/K/V projections for one batch element.

    x_ref: (1, L_x, D)   s_ref: (1, L_kv, D)
    w*_ref: (Dout, D)  (torch nn.Linear layout — consumed directly, no transpose)
    b*_ref: (1, Dout)
    """
    x = x_ref[0]                                        # (L_x, D)
    s = s_ref[0]                                        # (L_kv, D)

    q = jax.lax.dot_general(x, wq_ref[...], _TRANS_B,
                            preferred_element_type=jnp.float32)
    q_ref[0] = ((q + bq_ref[...]) * scale).astype(q_ref.dtype)

    k = jax.lax.dot_general(s, wk_ref[...], _TRANS_B,
                            preferred_element_type=jnp.float32)
    k_ref[0] = ((k + bk_ref[...]) * scale).astype(k_ref.dtype)

    v = jax.lax.dot_general(s, wv_ref[...], _TRANS_B,
                            preferred_element_type=jnp.float32)
    v_ref[0] = (v + bv_ref[...]).astype(v_ref.dtype)


def _attn_kernel(q_ref, k_ref, v_ref, o_ref, *, num_heads):
    """softmax(Q^T K) @ V^T for all heads of one batch element.

    q_ref: (H, dk, L_q)   k_ref: (H, dk, L_kv)   v_ref: (H, dv, L_kv)
    o_ref: (H, L_q, dv)
    Refs hold the exact torch `.view(B*H, d, L)` layout; Q's per-head transpose
    happens in-kernel (XLU) and V is consumed untransposed via an NT contraction.
    """
    for h in range(num_heads):                          # static unroll over heads
        q = q_ref[h]                                    # (dk, L_q)
        k = k_ref[h]                                    # (dk, L_kv)
        v = v_ref[h]                                    # (dv, L_kv)
        s = jnp.dot(q.T, k, preferred_element_type=jnp.float32)   # (L_q, L_kv)
        s = s - jnp.max(s, axis=-1, keepdims=True)                 # stable softmax
        p = jnp.exp(s)
        p = p * pl.reciprocal(jnp.sum(p, axis=-1, keepdims=True), approx=True)
        a = jax.lax.dot_general(p, v, _TRANS_B,
                                preferred_element_type=jnp.float32)  # (L_q, dv)
        o_ref[h] = a.astype(o_ref.dtype)


def _out_proj_kernel(a_ref, w_ref, b_ref, o_ref):
    # a: (tm, Dv), w: (D, Dv) torch layout, b: (1, D) -> o: (tm, D)
    acc = jax.lax.dot_general(a_ref[...], w_ref[...], _TRANS_B,
                              preferred_element_type=jnp.float32)
    o_ref[...] = (acc + b_ref[...]).astype(o_ref.dtype)


# ---------------------------------------------------------------------------
# Pallas wrappers
# ---------------------------------------------------------------------------
def _row_tile(m):
    for t in (512, 256, 128, 64, 32, 16, 8):
        if m % t == 0:
            return t
    return m


def qkv_proj_pallas(x, src, wq, bq, wk, bk, wv, bv, scale):
    B, L_x, D = x.shape
    _, L_kv, _ = src.shape
    Dq, Dk, Dv = wq.shape[0], wk.shape[0], wv.shape[0]
    kern = functools.partial(_qkv_kernel, scale=float(scale))

    def const(shape):
        return pl.BlockSpec(shape, lambda b: (0,) * len(shape))

    return pl.pallas_call(
        kern,
        out_shape=(
            jax.ShapeDtypeStruct((B, L_x, Dq), jnp.float32),
            jax.ShapeDtypeStruct((B, L_kv, Dk), jnp.float32),
            jax.ShapeDtypeStruct((B, L_kv, Dv), jnp.float32),
        ),
        grid=(B,),
        in_specs=[
            pl.BlockSpec((1, L_x, D), lambda b: (b, 0, 0)),
            pl.BlockSpec((1, L_kv, D), lambda b: (b, 0, 0)),
            const((Dq, D)), const((1, Dq)),
            const((Dk, D)), const((1, Dk)),
            const((Dv, D)), const((1, Dv)),
        ],
        out_specs=(
            pl.BlockSpec((1, L_x, Dq), lambda b: (b, 0, 0)),
            pl.BlockSpec((1, L_kv, Dk), lambda b: (b, 0, 0)),
            pl.BlockSpec((1, L_kv, Dv), lambda b: (b, 0, 0)),
        ),
        compiler_params=pltpu.CompilerParams(dimension_semantics=("parallel",)),
    )(x, src, wq, bq.reshape(1, Dq), wk, bk.reshape(1, Dk), wv, bv.reshape(1, Dv))


def attention_pallas(qh, kh, vh, *, num_heads):
    BH, dk, L_q = qh.shape
    _, _, L_kv = kh.shape
    _, dv, _ = vh.shape
    H = num_heads
    B = BH // H
    kern = functools.partial(_attn_kernel, num_heads=H)
    return pl.pallas_call(
        kern,
        out_shape=jax.ShapeDtypeStruct((BH, L_q, dv), jnp.float32),
        grid=(B,),
        in_specs=[
            pl.BlockSpec((H, dk, L_q), lambda b: (b, 0, 0)),
            pl.BlockSpec((H, dk, L_kv), lambda b: (b, 0, 0)),
            pl.BlockSpec((H, dv, L_kv), lambda b: (b, 0, 0)),
        ],
        out_specs=pl.BlockSpec((H, L_q, dv), lambda b: (b, 0, 0)),
        compiler_params=pltpu.CompilerParams(dimension_semantics=("parallel",)),
    )(qh, kh, vh)


def out_proj_pallas(a2, wo, bo):
    M, Dv = a2.shape
    Dout = wo.shape[0]
    tm = _row_tile(M)
    return pl.pallas_call(
        _out_proj_kernel,
        out_shape=jax.ShapeDtypeStruct((M, Dout), jnp.float32),
        grid=(M // tm,),
        in_specs=[
            pl.BlockSpec((tm, Dv), lambda i: (i, 0)),
            pl.BlockSpec((Dout, Dv), lambda i: (0, 0)),
            pl.BlockSpec((1, Dout), lambda i: (0, 0)),
        ],
        out_specs=pl.BlockSpec((tm, Dout), lambda i: (i, 0)),
        compiler_params=pltpu.CompilerParams(dimension_semantics=("parallel",)),
    )(a2, wo, bo.reshape(1, Dout))


# ---------------------------------------------------------------------------
# MultiHeadAttentionBlock forward (matches the PyTorch reference semantics)
# ---------------------------------------------------------------------------
def multi_head_attention_block(x, y, params, *, num_heads, cross_attn):
    # x ~ data_x.x, y ~ data_y.x
    if x.ndim < 3:
        x = x[None]
    if y.ndim < 3:
        y = y[None]
    B, L_x, D = x.shape
    scale = 1.0 / math.sqrt(D)

    src = y if cross_attn else x
    L_kv = src.shape[1]
    H = num_heads

    # 1) Fused Q/K/V projections (single pallas_call, batch grid).
    Q, K, V = qkv_proj_pallas(x, src,
                              params["wq"], params["bq"],
                              params["wk"], params["bk"],
                              params["wv"], params["bv"], scale)

    dk = Q.shape[-1] // H
    dv = V.shape[-1] // H

    # torch's `.view(B*H, d, L)` head split: pure contiguous reinterpretations
    # (no HBM transpose passes — the needed transposes happen inside the kernel).
    Qh = Q.reshape(B * H, dk, L_x)
    Kh = K.reshape(B * H, dk, L_kv)
    Vh = V.reshape(B * H, dv, L_kv)

    # 2) Attention (single pallas_call, batch grid, all heads per step).
    a = attention_pallas(Qh, Kh, Vh, num_heads=H)           # (B*H, L_x, dv)

    # torch's contiguous `a.reshape(B, L_x, D)` (requires H*dv == D, as in torch).
    a2 = a.reshape(B * L_x, H * dv)

    # 3) Output projection (row-tiled).
    out = out_proj_pallas(a2, params["wo"], params["bo"])
    return out.reshape(B, L_x, D)
    # TODO(synk): dropout_p from __init__ is never applied in the reference forward
    # (and the debug print() calls are omitted), so neither is modeled here.


# ---------------------------------------------------------------------------
# Pure-JAX reference (mirrors the torch ops) for a correctness check.
# ---------------------------------------------------------------------------
def reference_forward(x, y, params, *, num_heads, cross_attn):
    B, L_x, D = x.shape
    _, L_y, _ = y.shape
    scale = 1.0 / math.sqrt(D)
    src = y if cross_attn else x
    L_kv = L_y if cross_attn else L_x
    lin = lambda z, w, b: jnp.einsum("bld,od->blo", z, w) + b
    Q = lin(x, params["wq"], params["bq"]) * scale
    K = lin(src, params["wk"], params["bk"]) * scale
    V = lin(src, params["wv"], params["bv"])
    H = num_heads
    dk = Q.shape[-1] // H
    dv = V.shape[-1] // H
    Qh = jnp.transpose(Q.reshape(B * H, dk, L_x), (0, 2, 1))
    Kh = K.reshape(B * H, dk, L_kv)
    w = jax.nn.softmax(jnp.einsum("gqd,gdk->gqk", Qh, Kh), axis=-1)
    Vh = jnp.transpose(V.reshape(B * H, dv, L_y), (0, 2, 1))
    a = jnp.einsum("gqk,gkd->gqd", w, Vh).reshape(B, L_x, D)
    return jnp.einsum("bld,od->blo", a, params["wo"]) + params["bo"]


# ---------------------------------------------------------------------------
if __name__ == "__main__":
    # Module hyperparameters
    num_heads = 2
    d_model = 32
    key_dim = 16            # H * key_dim   = 32
    value_dim = 16          # H * value_dim = 32 == d_model (required by a.reshape)
    cross_attn = True

    B, L_x, L_y = 2, 8, 8

    key = jax.random.PRNGKey(0)
    ks = jax.random.split(key, 10)
    init = lambda k, shape, fan_in: jax.random.uniform(
        k, shape, jnp.float32, -1.0 / math.sqrt(fan_in), 1.0 / math.sqrt(fan_in))

    params = {
        "wq": init(ks[0], (key_dim * num_heads, d_model), d_model),
        "bq": init(ks[1], (key_dim * num_heads,), d_model),
        "wk": init(ks[2], (key_dim * num_heads, d_model), d_model),
        "bk": init(ks[3], (key_dim * num_heads,), d_model),
        "wv": init(ks[4], (value_dim * num_heads, d_model), d_model),
        "bv": init(ks[5], (value_dim * num_heads,), d_model),
        "wo": init(ks[6], (d_model, value_dim * num_heads), value_dim * num_heads),
        "bo": init(ks[7], (d_model,), value_dim * num_heads),
    }

    x = jax.random.normal(ks[8], (B, L_x, d_model), jnp.float32)
    y = jax.random.normal(ks[9], (B, L_y, d_model), jnp.float32)

    out = multi_head_attention_block(x, y, params, num_heads=num_heads, cross_attn=cross_attn)
    out = jax.block_until_ready(out)

    ref = reference_forward(x, y, params, num_heads=num_heads, cross_attn=cross_attn)
    # tolerance loosened slightly vs. f32-exact because of approx reciprocal (EUP vrcp).
    np.testing.assert_allclose(np.asarray(out), np.asarray(ref), rtol=2e-3, atol=2e-3)

    print("KERNEL_OK")
</pallas_src>

<mosaic_0001>
module attributes {stable_mosaic.version = 11 : i64} {
  func.func @_qkv_kernel(%arg0: i32, %arg1: memref<1x8x32xf32, #tpu.memory_space<vmem>>, %arg2: memref<1x8x32xf32, #tpu.memory_space<vmem>>, %arg3: memref<32x32xf32, #tpu.memory_space<vmem>>, %arg4: memref<1x32xf32, #tpu.memory_space<vmem>>, %arg5: memref<32x32xf32, #tpu.memory_space<vmem>>, %arg6: memref<1x32xf32, #tpu.memory_space<vmem>>, %arg7: memref<32x32xf32, #tpu.memory_space<vmem>>, %arg8: memref<1x32xf32, #tpu.memory_space<vmem>>, %arg9: memref<1x8x32xf32, #tpu.memory_space<vmem>>, %arg10: memref<1x8x32xf32, #tpu.memory_space<vmem>>, %arg11: memref<1x8x32xf32, #tpu.memory_space<vmem>>) attributes {dimension_semantics = [#tpu.dimension_semantics<parallel>], iteration_bounds = array<i64: 2>, scalar_prefetch = 0 : i64, scratch_operands = 0 : i64, tpu.core_type = #tpu.core_type<tc>, window_params = [{transform_indices = @transform_0, window_bounds = array<i64: 1, 8, 32>}, {transform_indices = @transform_1, window_bounds = array<i64: 1, 8, 32>}, {pipeline_mode = #tpu.pipeline_mode<synchronous>, transform_indices = @transform_2, window_bounds = array<i64: 32, 32>}, {pipeline_mode = #tpu.pipeline_mode<synchronous>, transform_indices = @transform_3, window_bounds = array<i64: 1, 32>}, {pipeline_mode = #tpu.pipeline_mode<synchronous>, transform_indices = @transform_4, window_bounds = array<i64: 32, 32>}, {pipeline_mode = #tpu.pipeline_mode<synchronous>, transform_indices = @transform_5, window_bounds = array<i64: 1, 32>}, {pipeline_mode = #tpu.pipeline_mode<synchronous>, transform_indices = @transform_6, window_bounds = array<i64: 32, 32>}, {pipeline_mode = #tpu.pipeline_mode<synchronous>, transform_indices = @transform_7, window_bounds = array<i64: 1, 32>}, {transform_indices = @transform_8, window_bounds = array<i64: 1, 8, 32>}, {transform_indices = @transform_9, window_bounds = array<i64: 1, 8, 32>}, {transform_indices = @transform_10, window_bounds = array<i64: 1, 8, 32>}]} {
    %c0 = arith.constant 0 : index
    %c0_0 = arith.constant 0 : index
    %c0_1 = arith.constant 0 : index
    %0 = vector.load %arg1[%c0, %c0_0, %c0_1] : memref<1x8x32xf32, #tpu.memory_space<vmem>>, vector<1x8x32xf32>
    %1 = vector.shape_cast %0 : vector<1x8x32xf32> to vector<8x32xf32>
    %c0_2 = arith.constant 0 : index
    %c0_3 = arith.constant 0 : index
    %c0_4 = arith.constant 0 : index
    %2 = vector.load %arg2[%c0_2, %c0_3, %c0_4] : memref<1x8x32xf32, #tpu.memory_space<vmem>>, vector<1x8x32xf32>
    %3 = vector.shape_cast %2 : vector<1x8x32xf32> to vector<8x32xf32>
    %c0_5 = arith.constant 0 : index
    %c0_6 = arith.constant 0 : index
    %4 = vector.load %arg3[%c0_5, %c0_6] : memref<32x32xf32, #tpu.memory_space<vmem>>, vector<32x32xf32>
    %cst = arith.constant dense<0.000000e+00> : vector<8x32xf32>
    %5 = tpu.matmul %1, %4, %cst {dimension_numbers = #tpu.dot_dimension_numbers<[1], [1], [0], [0], [0, 0, 1, 0], [], []>} : vector<8x32xf32>, vector<32x32xf32>, vector<8x32xf32> -> vector<8x32xf32>
    %c0_7 = arith.constant 0 : index
    %c0_8 = arith.constant 0 : index
    %6 = vector.load %arg4[%c0_7, %c0_8] : memref<1x32xf32, #tpu.memory_space<vmem>>, vector<1x32xf32>
    %7 = vector.broadcast %6 : vector<1x32xf32> to vector<8x32xf32>
    %8 = arith.addf %5, %7 : vector<8x32xf32>
    %cst_9 = arith.constant 0.176776692 : f32
    %9 = vector.broadcast %cst_9 : f32 to vector<8x32xf32>
    %10 = arith.mulf %8, %9 : vector<8x32xf32>
    %c0_10 = arith.constant 0 : index
    %c0_11 = arith.constant 0 : index
    %c0_12 = arith.constant 0 : index
    %11 = vector.load %arg9[%c0_10, %c0_11, %c0_12] : memref<1x8x32xf32, #tpu.memory_space<vmem>>, vector<1x8x32xf32>
    %12 = vector.shape_cast %11 : vector<1x8x32xf32> to vector<8x32xf32>
    %13 = vector.shape_cast %10 : vector<8x32xf32> to vector<1x8x32xf32>
    tpu.vector_store %arg9[%c0_10, %c0_11, %c0_12], %13 {strides = array<i32>} : memref<1x8x32xf32, #tpu.memory_space<vmem>>, vector<1x8x32xf32>,
    %c0_13 = arith.constant 0 : index
    %c0_14 = arith.constant 0 : index
    %14 = vector.load %arg5[%c0_13, %c0_14] : memref<32x32xf32, #tpu.memory_space<vmem>>, vector<32x32xf32>
    %cst_15 = arith.constant dense<0.000000e+00> : vector<8x32xf32>
    %15 = tpu.matmul %3, %14, %cst_15 {dimension_numbers = #tpu.dot_dimension_numbers<[1], [1], [0], [0], [0, 0, 1, 0], [], []>} : vector<8x32xf32>, vector<32x32xf32>, vector<8x32xf32> -> vector<8x32xf32>
    %c0_16 = arith.constant 0 : index
    %c0_17 = arith.constant 0 : index
    %16 = vector.load %arg6[%c0_16, %c0_17] : memref<1x32xf32, #tpu.memory_space<vmem>>, vector<1x32xf32>
    %17 = vector.broadcast %16 : vector<1x32xf32> to vector<8x32xf32>
    %18 = arith.addf %15, %17 : vector<8x32xf32>
    %cst_18 = arith.constant 0.176776692 : f32
    %19 = vector.broadcast %cst_18 : f32 to vector<8x32xf32>
    %20 = arith.mulf %18, %19 : vector<8x32xf32>
    %c0_19 = arith.constant 0 : index
    %c0_20 = arith.constant 0 : index
    %c0_21 = arith.constant 0 : index
    %21 = vector.load %arg10[%c0_19, %c0_20, %c0_21] : memref<1x8x32xf32, #tpu.memory_space<vmem>>, vector<1x8x32xf32>
    %22 = vector.shape_cast %21 : vector<1x8x32xf32> to vector<8x32xf32>
    %23 = vector.shape_cast %20 : vector<8x32xf32> to vector<1x8x32xf32>
    tpu.vector_store %arg10[%c0_19, %c0_20, %c0_21], %23 {strides = array<i32>} : memref<1x8x32xf32, #tpu.memory_space<vmem>>, vector<1x8x32xf32>,
    %c0_22 = arith.constant 0 : index
    %c0_23 = arith.constant 0 : index
    %24 = vector.load %arg7[%c0_22, %c0_23] : memref<32x32xf32, #tpu.memory_space<vmem>>, vector<32x32xf32>
    %cst_24 = arith.constant dense<0.000000e+00> : vector<8x32xf32>
    %25 = tpu.matmul %3, %24, %cst_24 {dimension_numbers = #tpu.dot_dimension_numbers<[1], [1], [0], [0], [0, 0, 1, 0], [], []>} : vector<8x32xf32>, vector<32x32xf32>, vector<8x32xf32> -> vector<8x32xf32>
    %c0_25 = arith.constant 0 : index
    %c0_26 = arith.constant 0 : index
    %26 = vector.load %arg8[%c0_25, %c0_26] : memref<1x32xf32, #tpu.memory_space<vmem>>, vector<1x32xf32>
    %27 = vector.broadcast %26 : vector<1x32xf32> to vector<8x32xf32>
    %28 = arith.addf %25, %27 : vector<8x32xf32>
    %c0_27 = arith.constant 0 : index
    %c0_28 = arith.constant 0 : index
    %c0_29 = arith.constant 0 : index
    %29 = vector.load %arg11[%c0_27, %c0_28, %c0_29] : memref<1x8x32xf32, #tpu.memory_space<vmem>>, vector<1x8x32xf32>
    %30 = vector.shape_cast %29 : vector<1x8x32xf32> to vector<8x32xf32>
    %31 = vector.shape_cast %28 : vector<8x32xf32> to vector<1x8x32xf32>
    tpu.vector_store %arg11[%c0_27, %c0_28, %c0_29], %31 {strides = array<i32>} : memref<1x8x32xf32, #tpu.memory_space<vmem>>, vector<1x8x32xf32>,
    return
  }
  func.func @transform_0(%arg0: i32) -> (i32, i32, i32) {
    %c0_i32 = arith.constant 0 : i32
    %c0_i32_0 = arith.constant 0 : i32
    %c0_i32_1 = arith.constant 0 : i32
    return %arg0, %c0_i32, %c0_i32_0 : i32, i32, i32
  }
  func.func @transform_1(%arg0: i32) -> (i32, i32, i32) {
    %c0_i32 = arith.constant 0 : i32
    %c0_i32_0 = arith.constant 0 : i32
    %c0_i32_1 = arith.constant 0 : i32
    return %arg0, %c0_i32, %c0_i32_0 : i32, i32, i32
  }
  func.func @transform_2(%arg0: i32) -> (i32, i32) {
    %c0_i32 = arith.constant 0 : i32
    %c0_i32_0 = arith.constant 0 : i32
    %c0_i32_1 = arith.constant 0 : i32
    return %c0_i32, %c0_i32_0 : i32, i32
  }
  func.func @transform_3(%arg0: i32) -> (i32, i32) {
    %c0_i32 = arith.constant 0 : i32
    %c0_i32_0 = arith.constant 0 : i32
    %c0_i32_1 = arith.constant 0 : i32
    return %c0_i32, %c0_i32_0 : i32, i32
  }
  func.func @transform_4(%arg0: i32) -> (i32, i32) {
    %c0_i32 = arith.constant 0 : i32
    %c0_i32_0 = arith.constant 0 : i32
    %c0_i32_1 = arith.constant 0 : i32
    return %c0_i32, %c0_i32_0 : i32, i32
  }
  func.func @transform_5(%arg0: i32) -> (i32, i32) {
    %c0_i32 = arith.constant 0 : i32
    %c0_i32_0 = arith.constant 0 : i32
    %c0_i32_1 = arith.constant 0 : i32
    return %c0_i32, %c0_i32_0 : i32, i32
  }
  func.func @transform_6(%arg0: i32) -> (i32, i32) {
    %c0_i32 = arith.constant 0 : i32
    %c0_i32_0 = arith.constant 0 : i32
    %c0_i32_1 = arith.constant 0 : i32
    return %c0_i32, %c0_i32_0 : i32, i32
  }
  func.func @transform_7(%arg0: i32) -> (i32, i32) {
    %c0_i32 = arith.constant 0 : i32
    %c0_i32_0 = arith.constant 0 : i32
    %c0_i32_1 = arith.constant 0 : i32
    return %c0_i32, %c0_i32_0 : i32, i32
  }
  func.func @transform_8(%arg0: i32) -> (i32, i32, i32) {
    %c0_i32 = arith.constant 0 : i32
    %c0_i32_0 = arith.constant 0 : i32
    %c0_i32_1 = arith.constant 0 : i32
    return %arg0, %c0_i32, %c0_i32_0 : i32, i32, i32
  }
  func.func @transform_9(%arg0: i32) -> (i32, i32, i32) {
    %c0_i32 = arith.constant 0 : i32
    %c0_i32_0 = arith.constant 0 : i32
    %c0_i32_1 = arith.constant 0 : i32
    return %arg0, %c0_i32, %c0_i32_0 : i32, i32, i32
  }
  func.func @transform_10(%arg0: i32) -> (i32, i32, i32) {
    %c0_i32 = arith.constant 0 : i32
    %c0_i32_0 = arith.constant 0 : i32
    %c0_i32_1 = arith.constant 0 : i32
    return %arg0, %c0_i32, %c0_i32_0 : i32, i32, i32
  }
}

</mosaic_0001>

<bundles_post_ra>
// kernel: tpu_custom_call.1
= control target key start
LH: loop header
LB: loop body
LE: loop exit
PB: predicated region body
PF: predicated region fallthrough
CT: control target
= control target key end

     0   :  { %s1850_s0 = inlined_call_operand.hbm [shape: f32[2,8,32], index: 0, kind: input, shape index: {}]   ;;  %s1851_s1 = inlined_call_operand.hbm [shape: f32[2,8,32], index: 1, kind: input, shape index: {}]   ;;  %s1852_s2 = inlined_call_operand.hbm [shape: f32[32,32], index: 2, kind: input, shape index: {}]   ;;  %s1853_s3 = inlined_call_operand.vmem [shape: f32[1,32], index: 3, kind: input, shape index: {}]   ;;  %s1854_s4 = inlined_call_operand.hbm [shape: f32[32,32], index: 4, kind: input, shape index: {}]   ;;  %s1855_s5 = inlined_call_operand.vmem [shape: f32[1,32], index: 5, kind: input, shape index: {}]   ;;  %s1856_s6 = inlined_call_operand.hbm [shape: f32[32,32], index: 6, kind: input, shape index: {}]   ;;  %s1857_s7 = inlined_call_operand.vmem [shape: f32[1,32], index: 7, kind: input, shape index: {}]   ;;  %s1858_s8 = inlined_call_operand.hbm [shape: f32[2,8,32], index: 8, kind: output, shape index: {0}]   ;;  %s1859_s9 = inlined_call_operand.hbm [shape: f32[2,8,32], index: 9, kind: output, shape index: {1}]   ;;  %s1860_s10 = inlined_call_operand.hbm [shape: f32[2,8,32], index: 10, kind: output, shape index: {2}]  }
   0x1   :  { %1870 = sst [smem:[#allocation25_spill]] %s1852_s2 }
   0x2   :  { %1871 = sst [smem:[#allocation26_spill]] %s1854_s4 }
   0x3   :  { %1872 = sst [smem:[#allocation27_spill]] %s1856_s6 }
   0x4   :  { %16 = vsyncpa [#allocation3], 0 }
   0x5   :  { %18 = vsyncpa [#allocation3 + $0x1], 0 }
   0x6   :  { %19 = vsyncpa [#allocation6], 0 }
   0x7   :  { %21 = vsyncpa [#allocation6 + $0x1], 0 }
   0x8   :  { %22 = vsyncpa [#allocation9], 0 }
   0x9   :  { %23 = vsyncpa [#allocation4], 0 }
   0xa   :  { %25 = vsyncpa [#allocation4 + $0x1], 0 }
   0xb   :  { %26 = vsyncpa [#allocation13], 0 }
   0xc   :  { %28 = vsyncpa [#allocation13 + $0x1], 0  ;;  %s1522_s13 = smov 0   ;;  %s1524_s14 = smov 0  }
   0xd   :  { %s1526_s15 = smov 0   ;;  %s1528_s16 = smov 0  }
   0xe LB: > { %1873 = sst [smem:[#allocation21_spill]] %s1449_s15  ;;  %s1543_s17 = sadd.s32 4294967295, %s1453_s16   ;;  %s1453_s16 = sphi %s1528_s16, %s1898_s16   ;;  %s1449_s15 = sphi %s1526_s15, %s1900_s15   ;;  %s1445_s14 = sphi %s1524_s14, %s1902_s14   ;;  %s1441_s13 = sphi %s1522_s13, %s1901_s13  }
   0xf   : > { %s1863_s18 = sadd.s32 4294967294, %s1453_s16   ;;  %p54_p0 = scmp.ne.s32.totalorder %s1445_s14, %s1441_s13 }
  0x10   : > { %p1861_p1 = scmp.eq.s32.totalorder %s1543_s17, 0  ;;  %p236_p3 = scmp.eq.s32.totalorder %s1863_s18, 1 }
  0x11   : > { %p999_p5 = scmp.ge.s32.totalorder %s1453_s16, 1  ;;  %p295_p7 = scmp.lt.s32.totalorder %s1453_s16, 3 }
  0x12   : > { %p1554_p4 = por %p1861_p1, %p54_p0  ;;  %p1559_p6 = por %p236_p3, %p54_p0 }
  0x13   : > { %p1564_p8 = pnand %p999_p5, %p295_p7  ;;  %s1455_s22 = smov [#allocation7]  }
  0x14   : > { %s1874_s19 = scalar_select %p1554_p4, 1, 0 }
  0x15   : > { %s1875_s20 = scalar_select %p1559_p6, 1, 0 }
  0x16   : > { %s1877_s21 = scalar_select %p1564_p8, 1, 0 }
  0x17   : > { %1876 = sst [smem:[#allocation22_spill]] %s1875_s20  ;;  %s307_s23 = sshll.u32 %s1455_s22, 4  ;;  %s308_s23 = int_to_ptr.vmem [resolvable:$true] %s307_s23 }
  0x18   : > { %p1113_p9 = pneg %p1564_p8  ;;  %s1456_s25 = smov [#allocation8]  }
  0x19   : > { %s323_s26 = sshll.u32 %s1456_s25, 4  ;;  %s1457_s27 = smov [#allocation10]   ;;  %s324_s26 = int_to_ptr.vmem [resolvable:$true] %s323_s26 }
  0x1a   : > { %p1573_p11 = pnand %p1113_p9, %p1861_p1  ;;  %s339_s28 = sshll.u32 %s1457_s27, 4  ;;  %s340_s28 = int_to_ptr.vmem [resolvable:$true] %s339_s28 }
  0x1b   : > { %s1198_s29 = scalar_lea.vmem %s308_s23, 512  ;;  %p1206_p5 = scmp.lt.s32.totalorder %s308_s23, %s308_s23 }
  0x1c   : > { %p1189_p12 = pneg %p1573_p11  ;;  %p1199_p13 = scmp.ne.s32.totalorder %s308_s23, %s1198_s29 }
  0x1d   : > { %p1207_p7 = scmp.lt.s32.totalorder %s1198_s29, %s1198_s29 }
  0x1e   : > { %p1201_p0 = pnand %p1199_p13, %p1189_p12 }
  0x1f   : > { %p1208_p9 = por %p1207_p7, %p1206_p5 }
  0x20   : > { %p1202_p3 = pneg %p1201_p0 }
  0x22   : > { %p1209_p10 = pnand %p1208_p9, %p1202_p3 }
  0x24   : > { %1212 = shalt.err (!%p1209_p10)
}
  0x25   : > { %s1458_s30 = smov 128   ;;  %s1459_s11 = smov 8  }
  0x26   : > { %s1879_s2 = sld [smem:[#allocation25_spill]]  ;;  %s1224_s25 = scalar_lea.vmem %s324_s26, 512 }
  0x27   : > { %p1225_p1 = scmp.ne.s32.totalorder %s324_s26, %s1224_s25  ;;  %p1232_p2 = scmp.lt.s32.totalorder %s324_s26, %s324_s26 }
  0x28   : > { %p1233_p6 = scmp.lt.s32.totalorder %s1224_s25, %s1224_s25 }
  0x29   : > { %p1227_p13 = pnand %p1225_p1, %p1189_p12 }
  0x2a   : > { %p1234_p5 = por %p1233_p6, %p1232_p2 }
  0x2b   : > { %p1228_p0 = pneg %p1227_p13 }
  0x2c   : > { %1116 = dma.hbm_to_vmem [thread:$0]  (!%p1573_p11), %s1879_s2, 512, %s308_s23, [#allocation6], %s1458_s30, %s1458_s30, %s1459_s11  }
  0x2d   : > { %p1235_p3 = pnand %p1234_p5, %p1228_p0 }
  0x2f   : > { %1238 = shalt.err (!%p1235_p3)
}
  0x30   : > { %s1880_s4 = sld [smem:[#allocation26_spill]]  ;;  %s1250_s23 = scalar_lea.vmem %s340_s28, 512 }
  0x31   : > { %p1251_p10 = scmp.ne.s32.totalorder %s340_s28, %s1250_s23  ;;  %p1258_p9 = scmp.lt.s32.totalorder %s340_s28, %s340_s28 }
  0x32   : > { %p1259_p13 = scmp.lt.s32.totalorder %s1250_s23, %s1250_s23 }
  0x33   : > { %p1253_p7 = pnand %p1251_p10, %p1189_p12 }
  0x34   : > { %p1260_p4 = por %p1259_p13, %p1258_p9 }
  0x35   : > { %p1254_p1 = pneg %p1253_p7 }
  0x36   : > { %1119 = dma.hbm_to_vmem [thread:$0]  (!%p1573_p11), %s1880_s4, 512, %s324_s26, [#allocation9], %s1458_s30, %s1458_s30, %s1459_s11  }
  0x37   : > { %p1261_p2 = pnand %p1260_p4, %p1254_p1 }
  0x39   : > { %1264 = shalt.err (!%p1261_p2)
}
  0x3a   : > { %s1881_s6 = sld [smem:[#allocation27_spill]]  ;;  %s1604_s26 = sadd.s32 1, %s1453_s16  }
  0x3b   : > { %1882 = sst [smem:[#allocation23_spill]] %s1604_s26  ;;  %s38_s25 = ssub.s32 %s1453_s16, %s1604_s26 }
  0x3c   : > { %s41_s24 = sadd.s32 1, %s1449_s15  ;;  %p39_p4 = scmp.eq.s32.totalorder %s38_s25, 0 }
  0x3d   : > { %p48_p6 = scmp.ne.s32.totalorder %s1449_s15, %s1445_s14  ;;  %p49_p12 = scmp.eq.s32.totalorder %s1453_s16, 0 }
  0x3e   : > { %p1143_p0 = scmp.lt.s32.totalorder %s1453_s16, 2  ;;  %p1884_p3 = scmp.eq.s32.totalorder %s1543_s17, 1 }
  0x3f   : > { %s1614_s27 = scalar_select %p39_p4, %s1449_s15, %s41_s24  }
  0x40   : > { %1122 = dma.hbm_to_vmem [thread:$0]  (!%p1573_p11), %s1881_s6, 512, %s340_s28, [#allocation9], %s1458_s30, %s1458_s30, %s1459_s11  }
  0x41   : > { %1883 = sst [smem:[#allocation24_spill]] %s1614_s27  ;;  %p50_p5 = por %p49_p12, %p48_p6 }
  0x42   : > { %p1618_p10 = por %p1884_p3, %p48_p6  ;;  %s356_s23 = sand.u32 1, %s1449_s15  }
  0x43   : > { %s1005_s12 = sshll.u32 %s1453_s16, 7  ;;  %s1624_s28 = sshll.u32 %s356_s23, 3 }
  0x44   : > { %s1885_s29 = scalar_select %p1618_p10, 1, 0 }
  0x45   : > { %s1629_s22 = scalar_lea.hbm %s1850_s0, %s1005_s12  ;;  %s360_s25 = scalar_lea.vmem [#allocation2], %s1624_s28 }
  0x46   : > { %s367_s24 = sshll.u32 %s360_s25, 4  ;;  %p1632_p11 = pnand %p1143_p0, %p50_p5  ;;  %s368_s24 = int_to_ptr.vmem [resolvable:$true] %s367_s24 }
  0x47   : > { %s1639_s6 = scalar_lea.hbm %s1851_s1, %s1005_s12  ;;  %s357_s30 = scalar_lea.sflag [#allocation3], %s356_s23 }
  0x48   : > { %s1265_s11 = scalar_lea.hbm %s1629_s22, 128  ;;  %p1267_p1 = pneg %p1632_p11 }
  0x49   : > { %p1266_p7 = scmp.ne.s32.totalorder %s1629_s22, %s1265_s11  ;;  %s1270_s15 = scalar_lea.hbm %s1850_s0, 256 }
  0x4a   : > { %p1271_p2 = scmp.lt.s32.totalorder %s1629_s22, %s1850_s0  ;;  %p1272_p4 = scmp.lt.s32.totalorder %s1270_s15, %s1265_s11 }
  0x4b   : > { %p1268_p9 = pnand %p1267_p1, %p1266_p7 }
  0x4c   : > { %p1273_p6 = por %p1272_p4, %p1271_p2 }
  0x4d   : > { %p1269_p13 = pneg %p1268_p9 }
  0x4f   : > { %p1274_p12 = pnand %p1273_p6, %p1269_p13 }
  0x51   : > { %1277 = shalt.err (!%p1274_p12)
}
  0x52   : > { %s1278_s2 = scalar_lea.vmem %s368_s24, 128  ;;  %s1460_s4 = smov [#allocation2]  }
  0x53   : > { %p1279_p0 = scmp.ne.s32.totalorder %s368_s24, %s1278_s2  ;;  %s1283_s23 = sshll.u32 %s1460_s4, 4  ;;  %s1284_s23 = int_to_ptr.vmem [resolvable:$false] %s1283_s23 }
  0x54   : > { %s1285_s27 = scalar_lea.vmem %s1284_s23, 256  ;;  %p1286_p7 = scmp.lt.s32.totalorder %s368_s24, %s1284_s23 }
  0x55   : > { %p1281_p5 = pnand %p1279_p0, %p1267_p1  ;;  %p1287_p9 = scmp.lt.s32.totalorder %s1285_s27, %s1278_s2 }
  0x57   : > { %p1282_p3 = pneg %p1281_p5  ;;  %p1288_p10 = por %p1287_p9, %p1286_p7 }
  0x59   : > { %p1289_p8 = pnand %p1288_p10, %p1282_p3 }
  0x5b   : > { %1292 = shalt.err (!%p1289_p8)
}
  0x5c   : > { %1126 = dma.hbm_to_vmem [thread:$0]  (!%p1632_p11), %s1629_s22, 128, %s368_s24, %s357_s30  }
  0x5d   : > { %s374_s15 = sand.u32 1, %s1453_s16   ;;  %s378_s20 = scalar_lea.vmem [#allocation5], %s1624_s28 }
  0x5e   : > { %s385_s26 = sshll.u32 %s378_s20, 4  ;;  %s375_s12 = scalar_lea.sflag [#allocation6], %s374_s15  ;;  %s386_s26 = int_to_ptr.vmem [resolvable:$true] %s385_s26 }
  0x5f   : > { %s1293_s11 = scalar_lea.hbm %s1639_s6, 128  ;;  %s1298_s4 = scalar_lea.hbm %s1851_s1, 256 }
  0x60   : > { %p1294_p13 = scmp.ne.s32.totalorder %s1639_s6, %s1293_s11  ;;  %p1299_p2 = scmp.lt.s32.totalorder %s1639_s6, %s1851_s1 }
  0x61   : > { %p1300_p4 = scmp.lt.s32.totalorder %s1298_s4, %s1293_s11 }
  0x62   : > { %p1296_p8 = pnand %p1294_p13, %p1267_p1 }
  0x63   : > { %p1301_p6 = por %p1300_p4, %p1299_p2 }
  0x64   : > { %p1297_p10 = pneg %p1296_p8 }
  0x66   : > { %p1302_p12 = pnand %p1301_p6, %p1297_p10 }
  0x68   : > { %1305 = shalt.err (!%p1302_p12)
}
  0x69   : > { %s1306_s28 = scalar_lea.vmem %s386_s26, 128  ;;  %s1461_s22 = smov [#allocation5]  }
  0x6a   : > { %p1307_p0 = scmp.ne.s32.totalorder %s386_s26, %s1306_s28  ;;  %s1311_s24 = sshll.u32 %s1461_s22, 4  ;;  %s1312_s24 = int_to_ptr.vmem [resolvable:$false] %s1311_s24 }
  0x6b   : > { %s1313_s30 = scalar_lea.vmem %s1312_s24, 256  ;;  %p1314_p7 = scmp.lt.s32.totalorder %s386_s26, %s1312_s24 }
  0x6c   : > { %p1309_p5 = pnand %p1307_p0, %p1267_p1  ;;  %p1315_p9 = scmp.lt.s32.totalorder %s1313_s30, %s1306_s28 }
  0x6e   : > { %p1310_p3 = pneg %p1309_p5  ;;  %p1316_p13 = por %p1315_p9, %p1314_p7 }
  0x70   : > { %p1317_p8 = pnand %p1316_p13, %p1310_p3 }
  0x72   : > { %1320 = shalt.err (!%p1317_p8)
}
  0x73   : > { %1129 = dma.hbm_to_vmem [thread:$0]  (!%p1632_p11), %s1639_s6, 128, %s386_s26, %s375_s12  }
  0x74   : > { %p1887_p10 = scmp.ne.s32.totalorder %s1877_s21, 0 }
  0x75   : > { %s1684_s15 = sand.u32 (!%p1887_p10), 1, %s1445_s14   ;;  %p1888_p1 = scmp.ne.s32.totalorder (!%p1887_p10), %s1874_s19, 0 }
  0x76   : > { %394 = sbr.rel (%p1887_p10) target bundleno = 407 (0x197), region = 52  ;;  %s1687_s20 = sshll.u32 (!%p1887_p10), %s1684_s15, 3 }
  0x77   : > { %s397_s11 = scalar_lea.sflag (!%p1887_p10), [#allocation3], %s1684_s15  ;;  %s400_s25 = scalar_lea.vmem (!%p1887_p10), [#allocation2], %s1687_s20 }
  0x7b   : > { %1416 = dma.done.wait (%p1888_p1), %s397_s11, 128  }
  0x7c   : > { %1418 = vsyncadd (%p1888_p1), %s397_s11, 4294967168  ;;  %s405_s6 = sand.u32 1, %s1543_s17   ;;  %s409_s21 = scalar_lea.vmem [#allocation5], %s1687_s20 }
  0x7d   : > { %s406_s18 = scalar_lea.sflag [#allocation6], %s405_s6 }
  0x7e   : > { %1420 = dma.done.wait (%p1888_p1), %s406_s18, 128  }
  0x7f   : > { %1422 = vsyncadd (%p1888_p1), %s406_s18, 4294967168  ;;  %p1889_p11 = scmp.eq.s32.totalorder %s1543_s17, 0 }
  0x81   : > { %1424 = dma.done.wait (%p1889_p11), [#allocation6], 512   ;;  %p1890_p2 = pmov %p1889_p11 }
  0x83   : > { %1426 = vsyncadd (%p1890_p2), [#allocation6], 4294966784  ;;  %p1891_p4 = pmov %p1890_p2 }
  0x84   : > { %p1892_p6 = pmov %p1890_p2 }
  0x85   : > { %1428 = dma.done.wait (%p1891_p4), [#allocation9], 1024  }
  0x86   : > { %1430 = vsyncadd (%p1892_p6), [#allocation9], 4294966272  ;;  %v1462_v0 = vmov 0.0   ;;  %vm1463_vm0 = vmmov 0   ;;  %vm486_vm1 = vcmask 261120   ;;  %v478_v1 = vld [vmem:[#allocation7 + $0x18] sm:$0xff] }
  0x87   : > { %1058 = vmatprep.subr.mxu0 %v1462_v0  ;;  %1069 = vmatprep.subr.mxu1 %v1462_v0  ;;  %v577_v2 = vld [vmem:[#allocation8 + $0x18] sm:$0xff]  ;;  %v477_v3 = vld [vmem:[#allocation7 + $0x10] sm:$0xff]  ;;  %v476_v5 = vld [vmem:[#allocation7 + $0x8] sm:$0xff]  ;;  %s1740_s4 = sshll.u32 %s1543_s17, 7  ;;  %s458_s23 = scalar_lea.vmem [#allocation11], %s1687_s20 }
  0x88   : > { %1066 = vmatprep.mubr.msk.f32.mxu0 %vm1463_vm0, %v1462_v0  ;;  %1077 = vmatprep.mubr.msk.f32.mxu1 %vm1463_vm0, %v1462_v0  ;;  %v576_v4 = vld [vmem:[#allocation8 + $0x10] sm:$0xff]  ;;  %v575_v6 = vld [vmem:[#allocation8 + $0x8] sm:$0xff]  ;;  %v475_v7 = vld [vmem:[#allocation7] sm:$0xff]  ;;  %s790_s27 = sshll.u32 %s458_s23, 4  ;;  %s465_s28 = scalar_lea.vmem [#allocation12], %s1687_s20  ;;  %s1750_s27 = int_to_ptr.vmem [resolvable:$true] %s790_s27 }
  0x89   : > { %1059 = vmatpush3.xpose.msk.msra.mxu0 %vm486_vm1, %v478_v1  ;;  %1070 = vmatpush3.xpose.msk.msra.mxu1 %vm486_vm1, %v577_v2  ;;  %v574_v8 = vld [vmem:[#allocation8] sm:$0xff]  ;;  %v675_v10 = vld [vmem:[#allocation10 + $0x18] sm:$0xff]  ;;  %v674_v12 = vld [vmem:[#allocation10 + $0x10] sm:$0xff]  ;;  %s803_s22 = sshll.u32 %s465_s28, 4  ;;  %s1748_s11 = scalar_lea.hbm %s1858_s8, %s1740_s4  ;;  %s1758_s22 = int_to_ptr.vmem [resolvable:$true] %s803_s22 }
  0x8a   : > { %1060 = vmatprep.subr.mxu0 %v1462_v0  ;;  %1071 = vmatprep.subr.mxu1 %v1462_v0  ;;  %v473_v9 = vld [vmem:[%s400_s25] sm:$0xff]  ;;  %v474_v11 = vld [vmem:[%s409_s21] sm:$0xff]  ;;  %s1756_s21 = scalar_lea.hbm %s1859_s9, %s1740_s4  ;;  %s767_s19 = scalar_lea.sflag [#allocation4], %s1684_s15 }
  0x8b   : > { %v673_v13 = vld [vmem:[#allocation10 + $0x8] sm:$0xff]  ;;  %v672_v14 = vld [vmem:[#allocation10] sm:$0xff]  ;;  %s1321_s26 = scalar_lea.vmem %s1750_s27, 128  ;;  %p1893_p0 = scmp.ne.s32.totalorder %s1885_s29, 0 }
  0x8c   : > { %v1017_v15 = vld [vmem:[%s1853_s3] ss:$0 sm:$0xff]  ;;  %p1322_p12 = scmp.ne.s32.totalorder %s1750_s27, %s1321_s26  ;;  %s1464_s12 = smov [#allocation11]  }
  0x8d   : > { %1061 = vmatpush3.xpose.msk.msra.mxu0 %vm486_vm1, %v477_v3  ;;  %1072 = vmatpush3.xpose.msk.msra.mxu1 %vm486_vm1, %v576_v4  ;;  %v1023_v16 = vld [vmem:[%s1855_s5] ss:$0 sm:$0xff]  ;;  %s1325_s2 = sshll.u32 %s1464_s12, 4  ;;  %s1326_s2 = int_to_ptr.vmem [resolvable:$false] %s1325_s2 }
  0x8e   : > { %1062 = vmatprep.subr.mxu0 %v1462_v0  ;;  %1073 = vmatprep.subr.mxu1 %v1462_v0  ;;  %p1323_p5 = pnand %p1322_p12, %p1893_p0  ;;  %s1327_s24 = scalar_lea.vmem %s1326_s2, 256 }
  0x8f   : > { %p1328_p7 = scmp.lt.s32.totalorder %s1750_s27, %s1326_s2  ;;  %p1329_p9 = scmp.lt.s32.totalorder %s1327_s24, %s1321_s26 }
  0x90   : > { %p1324_p3 = pneg %p1323_p5 }
  0x91   : > { %1063 = vmatpush3.xpose.msk.msra.mxu0 %vm486_vm1, %v476_v5  ;;  %1074 = vmatpush3.xpose.msk.msra.mxu1 %vm486_vm1, %v575_v6  ;;  %p1330_p13 = por %p1329_p9, %p1328_p7 }
  0x92   : > { %1064 = vmatprep.subr.mxu0 %v1462_v0  ;;  %1075 = vmatprep.subr.mxu1 %v1462_v0 }
  0x93   : > { %p1331_p8 = pnand %p1330_p13, %p1324_p3 }
  0x95   : > { %1065 = vmatpush3.xpose.msk.msra.mxu0 %vm486_vm1, %v475_v7  ;;  %1076 = vmatpush3.xpose.msk.msra.mxu1 %vm486_vm1, %v574_v8 }
  0x96   : > { %1080 = vmatprep.subr.mxu0 %v1462_v0 }
  0x98   : > { %1067 = vmatmul.mubr.msk.f32.vlgmr.msra.gmra.mxu0 %vm486_vm1, %v473_v9  ;;  %1078 = vmatmul.mubr.msk.f32.vlgmr.msra.gmra.mxu1 %vm486_vm1, %v474_v11 }
  0x99   : > { %1081 = vmatpush3.xpose.msk.msra.mxu0 %vm486_vm1, %v675_v10  ;;  %1088 = vmatprep.mubr.msk.f32.mxu0 %vm1463_vm0, %v1462_v0 }
  0x9a   : > { %1082 = vmatprep.subr.mxu0 %v1462_v0 }
  0x9d   : > { %1083 = vmatpush3.xpose.msk.msra.mxu0 %vm486_vm1, %v674_v12 }
  0x9e   : > { %1084 = vmatprep.subr.mxu0 %v1462_v0 }
  0xa1   : > { %1085 = vmatpush3.xpose.msk.msra.mxu0 %vm486_vm1, %v673_v13 }
  0xa2   : > { %1086 = vmatprep.subr.mxu0 %v1462_v0 }
  0xa5   : > { %1087 = vmatpush3.xpose.msk.msra.mxu0 %vm486_vm1, %v672_v14 }
  0xa8   : > { %1089 = vmatmul.mubr.msk.f32.vlgmr.msra.gmra.mxu0 %vm486_vm1, %v474_v11 }
 0x158   : > { %v568_v17 = vpop.f32.mrf.mxu0  ;;  %v666_v19 = vpop.f32.mrf.mxu1 }
 0x159   : > { %v569_v18 = vadd.f32 %v1017_v15, %v568_v17  ;;  %v667_v21 = vadd.f32 %v1023_v16, %v666_v19 }
 0x15a   : > { %v1068_v20 = vpop.f32.mrf.mxu0  ;;  %v1079_v23 = vpop.f32.mrf.mxu1 }
 0x15b   : > { %v572_v22 = vmul.f32 0.17677669, %v569_v18  ;;  %v670_v24 = vmul.f32 0.17677669, %v667_v21 }
 0x15d   : > { %573 = vst.msk [vmem:[%s458_s23] sm:$0xff] %vm486_vm1, %v572_v22  ;;  %671 = vst.msk [vmem:[%s465_s28] sm:$0xff] %vm486_vm1, %v670_v24 }
 0x15e   : > { %1334 = shalt.err (!%p1331_p8)
}
 0x15f   : > { %s1335_s23 = scalar_lea.hbm %s1748_s11, 128  ;;  %s1339_s30 = scalar_lea.hbm %s1858_s8, 256 }
 0x160   : > { %p1336_p10 = scmp.ne.s32.totalorder %s1748_s11, %s1335_s23  ;;  %p1340_p2 = scmp.lt.s32.totalorder %s1748_s11, %s1858_s8 }
 0x161   : > { %p1341_p4 = scmp.lt.s32.totalorder %s1339_s30, %s1335_s23 }
 0x162   : > { %p1337_p1 = pnand %p1336_p10, %p1893_p0 }
 0x163   : > { %p1342_p6 = por %p1341_p4, %p1340_p2 }
 0x164   : > { %p1338_p11 = pneg %p1337_p1 }
 0x166   : > { %p1343_p12 = pnand %p1342_p6, %p1338_p11 }
 0x168   : > { %1346 = shalt.err (!%p1343_p12)
}
 0x169   : > { %1107 = dma.vmem_to_hbm [thread:$0]  (%p1893_p0), %s1750_s27, 128, %s1748_s11, %s767_s19  }
 0x16a   : > { %s1785_s26 = scalar_lea.sflag [#allocation13], %s405_s6  ;;  %s1347_s12 = scalar_lea.vmem %s1758_s22, 128 }
 0x16b   : > { %p1348_p5 = scmp.ne.s32.totalorder %s1758_s22, %s1347_s12  ;;  %s1465_s2 = smov [#allocation12]  }
 0x16c   : > { %s1351_s24 = sshll.u32 %s1465_s2, 4  ;;  %s1352_s24 = int_to_ptr.vmem [resolvable:$false] %s1351_s24 }
 0x16d   : > { %p1349_p3 = pnand %p1348_p5, %p1893_p0  ;;  %s1353_s23 = scalar_lea.vmem %s1352_s24, 256 }
 0x16e   : > { %p1354_p9 = scmp.lt.s32.totalorder %s1758_s22, %s1352_s24  ;;  %p1355_p13 = scmp.lt.s32.totalorder %s1353_s23, %s1347_s12 }
 0x16f   : > { %p1350_p7 = pneg %p1349_p3 }
 0x170   : > { %p1356_p8 = por %p1355_p13, %p1354_p9 }
 0x172   : > { %p1357_p10 = pnand %p1356_p8, %p1350_p7 }
 0x174   : > { %1360 = shalt.err (!%p1357_p10)
}
 0x175   : > { %s1361_s17 = scalar_lea.hbm %s1756_s21, 128  ;;  %s1365_s11 = scalar_lea.hbm %s1859_s9, 256 }
 0x176   : > { %p1362_p1 = scmp.ne.s32.totalorder %s1756_s21, %s1361_s17  ;;  %p1366_p4 = scmp.lt.s32.totalorder %s1756_s21, %s1859_s9 }
 0x177   : > { %p1367_p6 = scmp.lt.s32.totalorder %s1365_s11, %s1361_s17 }
 0x178   : > { %p1363_p11 = pnand %p1362_p1, %p1893_p0 }
 0x179   : > { %p1368_p12 = por %p1367_p6, %p1366_p4 }
 0x17a   : > { %p1364_p2 = pneg %p1363_p11 }
 0x17c   : > { %p1369_p5 = pnand %p1368_p12, %p1364_p2 }
 0x17e   : > { %1372 = shalt.err (!%p1369_p5)
}
 0x17f   : > { %1108 = dma.vmem_to_hbm [thread:$0]  (%p1893_p0), %s1758_s22, 128, %s1756_s21, %s1785_s26   ;;  %v1029_v25 = vld [vmem:[%s1857_s7] ss:$0 sm:$0xff]  ;;  %v761_v26 = vpop.f32.mrf.mxu0 }
 0x180   : > { %s472_s25 = scalar_lea.vmem [#allocation14], %s1687_s20  ;;  %v762_v27 = vadd.f32 %v1029_v25, %v761_v26  ;;  %s814_s24 = scalar_lea.hbm %s1860_s10, %s1740_s4 }
 0x181   : > { %s816_s18 = sshll.u32 %s472_s25, 4  ;;  %v1090_v28 = vpop.f32.mrf.mxu0  ;;  %s1466_s22 = smov [#allocation14]   ;;  %s817_s18 = int_to_ptr.vmem [resolvable:$true] %s816_s18 }
 0x182   : > { %765 = vst.msk [vmem:[%s472_s25] sm:$0xff] %vm486_vm1, %v762_v27  ;;  %s1373_s23 = scalar_lea.vmem %s817_s18, 128  ;;  %s1377_s21 = sshll.u32 %s1466_s22, 4  ;;  %s1378_s21 = int_to_ptr.vmem [resolvable:$false] %s1377_s21 }
 0x183   : > { %p1374_p3 = scmp.ne.s32.totalorder %s817_s18, %s1373_s23  ;;  %s1379_s20 = scalar_lea.vmem %s1378_s21, 256 }
 0x184   : > { %p1380_p13 = scmp.lt.s32.totalorder %s817_s18, %s1378_s21  ;;  %p1381_p8 = scmp.lt.s32.totalorder %s1379_s20, %s1373_s23 }
 0x185   : > { %p1375_p7 = pnand %p1374_p3, %p1893_p0 }
 0x186   : > { %p1382_p10 = por %p1381_p8, %p1380_p13 }
 0x187   : > { %p1376_p9 = pneg %p1375_p7 }
 0x189   : > { %p1383_p1 = pnand %p1382_p10, %p1376_p9 }
 0x18b   : > { %1386 = shalt.err (!%p1383_p1)
}
 0x18c   : > { %s1387_s17 = scalar_lea.hbm %s814_s24, 128  ;;  %s1391_s27 = scalar_lea.hbm %s1860_s10, 256 }
 0x18d   : > { %p1388_p11 = scmp.ne.s32.totalorder %s814_s24, %s1387_s17  ;;  %p1392_p6 = scmp.lt.s32.totalorder %s814_s24, %s1860_s10 }
 0x18e   : > { %p1393_p12 = scmp.lt.s32.totalorder %s1391_s27, %s1387_s17 }
 0x18f   : > { %p1389_p2 = pnand %p1388_p11, %p1893_p0 }
 0x190   : > { %p1394_p5 = por %p1393_p12, %p1392_p6 }
 0x191   : > { %p1390_p4 = pneg %p1389_p2 }
 0x193   : > { %p1395_p3 = pnand %p1394_p5, %p1390_p4 }
 0x195   : > { %1398 = shalt.err (!%p1395_p3)
}
 0x196   : > { %1109 = dma.vmem_to_hbm [thread:$0]  (%p1893_p0), %s817_s18, 128, %s814_s24, %s1785_s26  }
 0x197 PF: > { %s1894_s15 = sld [smem:[#allocation22_spill]]  ;;  %s828_s28 = sand.u32 1, %s1441_s13  }
 0x198   : > { %p1896_p9 = scmp.ge.s32.totalorder %s1453_s16, 2  ;;  %s829_s30 = scalar_lea.sflag [#allocation4], %s828_s28 }
 0x19d   : > { %p1895_p7 = scmp.ne.s32.totalorder %s1894_s15, 0 }
 0x19f   : > { %p1131_p13 = pnand %p1896_p9, %p1895_p7 }
 0x1a1   : > { %p1132_p8 = pneg %p1131_p13 }
 0x1a3   : > { %1432 = dma.done.wait (%p1132_p8), %s829_s30, 128  }
 0x1a4   : > { %1434 = vsyncadd (%p1132_p8), %s829_s30, 4294967168  ;;  %s1897_s25 = sadd.s32 4294967294, %s1453_s16  }
 0x1a5   : > { %s837_s12 = sand.u32 1, %s1897_s25  }
 0x1a6   : > { %s838_s2 = scalar_lea.sflag [#allocation13], %s837_s12 }
 0x1a7   : > { %1436 = dma.done.wait (%p1132_p8), %s838_s2, 256  }
 0x1a8   : > { %1438 = vsyncadd (%p1132_p8), %s838_s2, 4294967040  ;;  %s1898_s16 = sld [smem:[#allocation23_spill]]  ;;  %s1901_s13 = smov %s1445_s14 }
 0x1a9   : > { %s1899_s29 = sld [smem:[#allocation21_spill]] }
 0x1aa   : > { %s1900_s15 = sld [smem:[#allocation24_spill]] }
 0x1ae   : > { %p31_p0 = scmp.ge.s32.totalorder %s1898_s16, 4  }
 0x1af   : > { %s1902_s14 = smov %s1899_s29 }
 0x1b0   :  { %33 = sbr.rel (!%p31_p0) target bundleno = 14 (0xe), region = 154 }
 0x1b5   :  { %852 = vsyncpa [#allocation3], 1 }
 0x1b6   :  { %854 = vsyncpa [#allocation3 + $0x1], 1 }
 0x1b7   :  { %855 = vsyncpa [#allocation6], 1 }
 0x1b8   :  { %857 = vsyncpa [#allocation6 + $0x1], 1 }
 0x1b9   :  { %858 = vsyncpa [#allocation9], 1 }
 0x1ba   :  { %859 = vsyncpa [#allocation4], 1 }
 0x1bb   :  { %861 = vsyncpa [#allocation4 + $0x1], 1 }
 0x1bc   :  { %862 = vsyncpa [#allocation13], 1 }
 0x1bd   :  { %864 = vsyncpa [#allocation13 + $0x1], 1 }

</bundles_post_ra>
